<compile_context>
chip_gen: v7x
topology: tpu7x:2x2x1
jax: 0.10.0
libtpu: 0.0.40
codegen_flags: <defaults>
</compile_context>

<pallas_src>
import functools

import jax
import jax.numpy as jnp
from jax.experimental import pallas as pl
from jax.experimental.pallas import tpu as pltpu


# ---------------------------------------------------------------------------
# Kernels
# ---------------------------------------------------------------------------

def se_block_kernel(x_ref, w1_ref, w2t_ref, o_ref, *, inv_hw):
    """Single-pass SE block. x_ref: (B_TILE, C, HW); weights are f32, (C//r, C)."""
    x = x_ref[...]
    # squeeze: global average pool over the spatial (lane) axis, f32 accumulation
    y = jnp.sum(x, axis=-1, dtype=jnp.float32) * inv_hw                    # (B, C)
    # excitation: Linear -> ReLU -> Linear -> Sigmoid (tiny MXU dots)
    h = jax.lax.dot_general(y, w1_ref[...], (((1,), (1,)), ((), ())),
                            preferred_element_type=jnp.float32)            # (B, C//r)
    h = jnp.maximum(h, 0.0)
    s = jnp.dot(h, w2t_ref[...], preferred_element_type=jnp.float32)       # (B, C)
    s = jax.nn.sigmoid(s)
    # scale: multiply in f32, single cast on store
    o_ref[...] = (x.astype(jnp.float32) * s[:, :, None]).astype(o_ref.dtype)


def se_block_hw_tiled_kernel(x_ref, w1_ref, w2t_ref, o_ref, acc_ref, s_ref, *, inv_hw):
    """Two-pass SE block for large C*HW: pass 0 pools, pass 1 scales.

    Grid = (batch_tiles, 2, hw_tiles); x_ref/o_ref: (B_TILE, C, HW_TILE);
    acc_ref/s_ref: f32 (B_TILE, C) scratch persisting across grid steps.
    """
    p = pl.program_id(1)   # 0 = pooling pass, 1 = scale pass
    k = pl.program_id(2)   # HW tile index

    @pl.when((p == 0) & (k == 0))
    def _():
        acc_ref[...] = jnp.zeros_like(acc_ref)

    @pl.when(p == 0)
    def _():
        acc_ref[...] += jnp.sum(x_ref[...], axis=-1, dtype=jnp.float32)

    @pl.when((p == 1) & (k == 0))
    def _():
        y = acc_ref[...] * inv_hw
        h = jax.lax.dot_general(y, w1_ref[...], (((1,), (1,)), ((), ())),
                                preferred_element_type=jnp.float32)
        h = jnp.maximum(h, 0.0)
        s = jnp.dot(h, w2t_ref[...], preferred_element_type=jnp.float32)
        s_ref[...] = jax.nn.sigmoid(s)

    @pl.when(p == 1)
    def _():
        o_ref[...] = (x_ref[...].astype(jnp.float32)
                      * s_ref[...][:, :, None]).astype(o_ref.dtype)


# ---------------------------------------------------------------------------
# Wrapper
# ---------------------------------------------------------------------------

def _tpu_generation():
    try:
        kind = jax.devices()[0].device_kind.lower()
    except Exception:
        return None
    for tag, gen in (("v7", 7), ("v6", 6), ("v5", 5)):
        if tag in kind:
            return gen
    return None


def _choose_batch_tile(bs, per_elem_bytes, target_bytes, *, prefer_even_grid):
    """Largest divisor of bs whose tile fits target_bytes.

    On v7x we prefer tiles that yield an even grid length so the 'parallel'
    batch axis splits evenly over the 2 TensorCores.
    """
    divisors = [d for d in range(1, bs + 1) if bs % d == 0]
    fitting = [d for d in divisors if d * per_elem_bytes <= target_bytes] or [1]
    b_tile = max(fitting)
    if prefer_even_grid:
        even = [d for d in fitting if (bs // d) % 2 == 0]
        if even:
            b_tile = max(even)
    return b_tile


def _choose_hw_tile(hw, c, itemsize, target_bytes):
    """Largest proper divisor of hw that is a multiple of 128 and fits the budget."""
    best = None
    for t in range(128, hw, 128):
        if hw % t == 0 and c * t * itemsize <= target_bytes:
            best = t
    return best


def se_block(x, w1, w2, *, target_tile_bytes=None):
    """SE block forward.  x: (N, C, H, W) NCHW; w1: (C//r, C); w2: (C, C//r).

    Weight layouts match PyTorch nn.Linear(..., bias=False) `.weight`.
    """
    bs, c, h, w = x.shape
    cr = w1.shape[0]
    assert w1.shape == (cr, c) and w2.shape == (c, cr), "expected PyTorch Linear layouts"
    hw = h * w
    itemsize = x.dtype.itemsize

    gen = _tpu_generation()
    if target_tile_bytes is None:
        if gen == 6:
            target_tile_bytes = 8 << 20    # 128 MiB physical VMEM, single TC
        elif gen == 7:
            target_tile_bytes = 4 << 20    # 64 MiB physical VMEM, 2 TCs
        else:                              # v5e (16 MiB scoped default) / unknown
            target_tile_bytes = 3 << 20

    # NCHW consumed directly as a free (N, C, HW) view -- no wrapper transposes.
    x3 = x.reshape(bs, c, hw)
    # Hoist weight cast / transpose out of the per-step hot path (tiny arrays).
    w1_f32 = w1.astype(jnp.float32)                     # (C//r, C)
    w2t_f32 = jnp.transpose(w2).astype(jnp.float32)     # (C//r, C)

    weight_bytes = 2 * cr * c * 4
    inv_hw = 1.0 / float(hw)
    per_elem_bytes = c * hw * itemsize

    cost = pl.CostEstimate(
        flops=2 * bs * c * hw + 4 * bs * c * cr,
        transcendentals=bs * c,
        bytes_accessed=2 * bs * c * hw * itemsize + weight_bytes,
    )

    hw_tile = None
    if per_elem_bytes > target_tile_bytes:
        hw_tile = _choose_hw_tile(hw, c, itemsize, target_tile_bytes)

    if hw_tile is None:
        # ---- single-pass path: whole (C, HW) plane(s) per grid step --------
        b_tile = _choose_batch_tile(bs, per_elem_bytes, target_tile_bytes,
                                    prefer_even_grid=(gen == 7))
        tile_bytes = b_tile * per_elem_bytes
        grid = (bs // b_tile,)
        kernel = functools.partial(se_block_kernel, inv_hw=inv_hw)
        grid_spec = pltpu.PrefetchScalarGridSpec(
            num_scalar_prefetch=0,
            grid=grid,
            in_specs=[
                pl.BlockSpec((b_tile, c, hw), lambda b: (b, 0, 0)),
                pl.BlockSpec((cr, c), lambda b: (0, 0)),
                pl.BlockSpec((cr, c), lambda b: (0, 0)),
            ],
            out_specs=pl.BlockSpec((b_tile, c, hw), lambda b: (b, 0, 0)),
        )
        dim_sem = ("parallel",)
    else:
        # ---- HW-tiled two-pass path (pool pass + scale pass) ---------------
        b_tile = _choose_batch_tile(bs, c * hw_tile * itemsize, target_tile_bytes,
                                    prefer_even_grid=(gen == 7))
        tile_bytes = b_tile * c * hw_tile * itemsize
        n_hw = hw // hw_tile
        grid = (bs // b_tile, 2, n_hw)
        kernel = functools.partial(se_block_hw_tiled_kernel, inv_hw=inv_hw)
        grid_spec = pltpu.PrefetchScalarGridSpec(
            num_scalar_prefetch=0,
            grid=grid,
            in_specs=[
                pl.BlockSpec((b_tile, c, hw_tile), lambda b, p, k: (b, 0, k)),
                pl.BlockSpec((cr, c), lambda b, p, k: (0, 0)),
                pl.BlockSpec((cr, c), lambda b, p, k: (0, 0)),
            ],
            # During the pooling pass all steps map to out block (b, 0, 0); it
            # is only flushed to HBM after pass-1 step-0 has written it, so no
            # garbage ever reaches HBM and the output is written exactly once.
            out_specs=pl.BlockSpec((b_tile, c, hw_tile),
                                   lambda b, p, k: (b, 0, k * p)),
            scratch_shapes=[pltpu.VMEM((b_tile, c), jnp.float32),   # pooled sums
                            pltpu.VMEM((b_tile, c), jnp.float32)],  # sigmoid scale
        )
        dim_sem = ("parallel", "arbitrary", "arbitrary")

    # Cover 2x(in) + 2x(out) double buffering plus the small weights/scratch.
    vmem_needed = 4 * tile_bytes + 4 * weight_bytes + (2 << 20)
    vmem_limit = max(vmem_needed, 16 << 20)
    vmem_limit = min(vmem_limit, (48 << 20) if gen == 7 else (100 << 20))

    out = pl.pallas_call(
        kernel,
        out_shape=jax.ShapeDtypeStruct((bs, c, hw), x.dtype),
        grid_spec=grid_spec,
        compiler_params=pltpu.CompilerParams(
            dimension_semantics=dim_sem,
            vmem_limit_bytes=int(vmem_limit),
        ),
        cost_estimate=cost,
    )(x3, w1_f32, w2t_f32)

    return out.reshape(bs, c, h, w)


def se_block_ref(x, w1, w2):
    """Pure-JAX reference mirroring the PyTorch forward."""
    y = jnp.mean(x.astype(jnp.float32), axis=(2, 3))            # (bs, c)
    h = jnp.maximum(y @ w1.T.astype(jnp.float32), 0.0)          # (bs, c//r)
    s = jax.nn.sigmoid(h @ w2.T.astype(jnp.float32))            # (bs, c)
    return (x.astype(jnp.float32) * s[:, :, None, None]).astype(x.dtype)


if __name__ == "__main__":
    # SE_Block(c=32, r=16) -> hidden size c//r = 2; HW = 16*16 = 256 (lane-dense).
    bs, c, r, spatial = 2, 32, 16, 16
    cr = c // r

    key = jax.random.PRNGKey(0)
    kx, k1, k2 = jax.random.split(key, 3)
    x = jax.random.normal(kx, (bs, c, spatial, spatial), dtype=jnp.float32)
    # PyTorch nn.Linear weight layout: (out_features, in_features), bias=False.
    w1 = jax.random.normal(k1, (cr, c), dtype=jnp.float32) * 0.1
    w2 = jax.random.normal(k2, (c, cr), dtype=jnp.float32) * 0.1

    ref = se_block_ref(x, w1, w2)

    # Single-pass path.
    out = jax.block_until_ready(se_block(x, w1, w2))
    assert out.shape == x.shape
    assert jnp.allclose(out, ref, atol=1e-5, rtol=1e-5), "single-pass mismatch"

    # Force the HW-tiled two-pass path (hw_tile = 128) to validate it as well.
    forced_target = c * 128 * x.dtype.itemsize
    out2 = jax.block_until_ready(se_block(x, w1, w2, target_tile_bytes=forced_target))
    assert jnp.allclose(out2, ref, atol=1e-5, rtol=1e-5), "hw-tiled mismatch"

    print("KERNEL_OK")
</pallas_src>

<mosaic_0001>
module attributes {stable_mosaic.version = 11 : i64} {
  func.func @se_block_kernel(%arg0: i32, %arg1: memref<2x32x256xf32, #tpu.memory_space<vmem>>, %arg2: memref<2x32xf32, #tpu.memory_space<vmem>>, %arg3: memref<2x32xf32, #tpu.memory_space<vmem>>, %arg4: memref<2x32x256xf32, #tpu.memory_space<vmem>>) attributes {dimension_semantics = [#tpu.dimension_semantics<parallel>], iteration_bounds = array<i64: 1>, scalar_prefetch = 0 : i64, scratch_operands = 0 : i64, tpu.core_type = #tpu.core_type<tc>, window_params = [{transform_indices = @transform_0, window_bounds = array<i64: 2, 32, 256>}, {pipeline_mode = #tpu.pipeline_mode<synchronous>, transform_indices = @transform_1, window_bounds = array<i64: 2, 32>}, {pipeline_mode = #tpu.pipeline_mode<synchronous>, transform_indices = @transform_2, window_bounds = array<i64: 2, 32>}, {transform_indices = @transform_3, window_bounds = array<i64: 2, 32, 256>}]} {
    %c0 = arith.constant 0 : index
    %c0_0 = arith.constant 0 : index
    %c0_1 = arith.constant 0 : index
    %0 = vector.load %arg1[%c0, %c0_0, %c0_1] : memref<2x32x256xf32, #tpu.memory_space<vmem>>, vector<2x32x256xf32>
    %cst = arith.constant dense<0.000000e+00> : vector<2x32xf32>
    %1 = vector.multi_reduction <add>, %0, %cst [2] : vector<2x32x256xf32> to vector<2x32xf32>
    %cst_2 = arith.constant 3.906250e-03 : f32
    %2 = vector.broadcast %cst_2 : f32 to vector<2x32xf32>
    %3 = arith.mulf %1, %2 : vector<2x32xf32>
    %c0_3 = arith.constant 0 : index
    %c0_4 = arith.constant 0 : index
    %4 = vector.load %arg2[%c0_3, %c0_4] : memref<2x32xf32, #tpu.memory_space<vmem>>, vector<2x32xf32>
    %cst_5 = arith.constant dense<0.000000e+00> : vector<2x2xf32>
    %5 = tpu.matmul %3, %4, %cst_5 {dimension_numbers = #tpu.dot_dimension_numbers<[1], [1], [0], [0], [0, 0, 1, 0], [], []>} : vector<2x32xf32>, vector<2x32xf32>, vector<2x2xf32> -> vector<2x2xf32>
    %cst_6 = arith.constant 0.000000e+00 : f32
    %6 = vector.broadcast %cst_6 : f32 to vector<2x2xf32>
    %7 = arith.maximumf %5, %6 : vector<2x2xf32>
    %c0_7 = arith.constant 0 : index
    %c0_8 = arith.constant 0 : index
    %8 = vector.load %arg3[%c0_7, %c0_8] : memref<2x32xf32, #tpu.memory_space<vmem>>, vector<2x32xf32>
    %cst_9 = arith.constant dense<0.000000e+00> : vector<2x32xf32>
    %9 = tpu.matmul %7, %8, %cst_9 {dimension_numbers = #tpu.dot_dimension_numbers<[1], [0], [0], [1], [0, 0, 1, 1], [], []>} : vector<2x2xf32>, vector<2x32xf32>, vector<2x32xf32> -> vector<2x32xf32>
    %10 = arith.negf %9 : vector<2x32xf32>
    %11 = math.exp %10 : vector<2x32xf32>
    %cst_10 = arith.constant 1.000000e+00 : f32
    %12 = vector.broadcast %cst_10 : f32 to vector<2x32xf32>
    %13 = arith.addf %12, %11 : vector<2x32xf32>
    %14 = arith.divf %12, %13 : vector<2x32xf32>
    %15 = vector.shape_cast %14 : vector<2x32xf32> to vector<2x32x1xf32>
    %16 = vector.broadcast %15 : vector<2x32x1xf32> to vector<2x32x256xf32>
    %17 = arith.mulf %0, %16 : vector<2x32x256xf32>
    %c0_11 = arith.constant 0 : index
    %c0_12 = arith.constant 0 : index
    %c0_13 = arith.constant 0 : index
    %18 = vector.load %arg4[%c0_11, %c0_12, %c0_13] : memref<2x32x256xf32, #tpu.memory_space<vmem>>, vector<2x32x256xf32>
    tpu.vector_store %arg4[%c0_11, %c0_12, %c0_13], %17 {strides = array<i32>} : memref<2x32x256xf32, #tpu.memory_space<vmem>>, vector<2x32x256xf32>,
    return
  }
  func.func @transform_0(%arg0: i32) -> (i32, i32, i32) {
    %c0_i32 = arith.constant 0 : i32
    %c0_i32_0 = arith.constant 0 : i32
    %c0_i32_1 = arith.constant 0 : i32
    return %arg0, %c0_i32, %c0_i32_0 : i32, i32, i32
  }
  func.func @transform_1(%arg0: i32) -> (i32, i32) {
    %c0_i32 = arith.constant 0 : i32
    %c0_i32_0 = arith.constant 0 : i32
    %c0_i32_1 = arith.constant 0 : i32
    return %c0_i32, %c0_i32_0 : i32, i32
  }
  func.func @transform_2(%arg0: i32) -> (i32, i32) {
    %c0_i32 = arith.constant 0 : i32
    %c0_i32_0 = arith.constant 0 : i32
    %c0_i32_1 = arith.constant 0 : i32
    return %c0_i32, %c0_i32_0 : i32, i32
  }
  func.func @transform_3(%arg0: i32) -> (i32, i32, i32) {
    %c0_i32 = arith.constant 0 : i32
    %c0_i32_0 = arith.constant 0 : i32
    %c0_i32_1 = arith.constant 0 : i32
    return %arg0, %c0_i32, %c0_i32_0 : i32, i32, i32
  }
}

</mosaic_0001>

<bundles_post_ra>
// kernel: tpu_custom_call.1
= control target key start
LH: loop header
LB: loop body
LE: loop exit
PB: predicated region body
PF: predicated region fallthrough
CT: control target
= control target key end

     0   :  { %8 = vsyncpa [#allocation3], 0  ;;  %s588_s0 = inlined_call_operand.hbm [shape: f32[2,32,256], index: 0, kind: input, shape index: {}]   ;;  %s589_s1 = inlined_call_operand.vmem [shape: f32[2,32], index: 1, kind: input, shape index: {}]   ;;  %s590_s2 = inlined_call_operand.vmem [shape: f32[2,32], index: 2, kind: input, shape index: {}]   ;;  %s591_s3 = inlined_call_operand.hbm [shape: f32[2,32,256], index: 3, kind: output, shape index: {}]  }
   0x1   :  { %9 = vsyncpa [#allocation4], 0  ;;  %s460_s12 = smov [#allocation2]   ;;  %s412_s16 = scalar_lea.hbm %s588_s0, 2048 }
   0x2   :  { %s15_s13 = sshll.u32 %s460_s12, 4  ;;  %p413_p0 = scmp.ne.s32.totalorder %s588_s0, %s412_s16  ;;  %s16_s13 = int_to_ptr.vmem [resolvable:$true] %s15_s13 }
   0x3   :  { %p416_p1 = scmp.lt.u32.totalorder %s412_s16, %s588_s0 }
   0x5   :  { %p418_p2 = pnand %p416_p1, %p413_p0 }
   0x7   :  { %421 = shalt.err (!%p418_p2)
}
   0x8   :  { %s422_s21 = scalar_lea.vmem %s16_s13, 2048  ;;  %p427_p4 = scmp.lt.s32.totalorder %s16_s13, %s16_s13 }
   0x9   :  { %p423_p3 = scmp.ne.s32.totalorder %s16_s13, %s422_s21  ;;  %p428_p5 = scmp.lt.s32.totalorder %s422_s21, %s422_s21 }
   0xb   :  { %p429_p6 = por %p428_p5, %p427_p4 }
   0xd   :  { %p430_p7 = pnand %p429_p6, %p423_p3 }
   0xf   :  { %433 = shalt.err (!%p430_p7)
}
  0x10   :  { %s461_s22 = smov 256   ;;  %s462_s23 = smov 16  }
  0x11   :  { %21 = dma.hbm_to_vmem [thread:$0]  %s588_s0, 2048, %s16_s13, [#allocation3], %s461_s22, %s461_s22, %s462_s23  }
  0x12   :  { %456 = dma.done.wait [#allocation3], 2048  }
  0x13   :  { %457 = vsyncadd [#allocation3], 4294965248  ;;  %v501_v0 = vld [vmem:[#allocation2 + $0x40] sm:$0xff]  ;;  %v503_v1 = vld [vmem:[#allocation2 + $0x48] sm:$0xff]  ;;  %v463_v24 = vmov 0.0   ;;  %vm134_vm0 = vcmask 261120   ;;  %v86_v26 = vlaneseq }
  0x14   :  { %v505_v2 = vld [vmem:[#allocation2] sm:$0xff]  ;;  %v57_v3 = vadd.f32 %v503_v1, %v501_v0  ;;  %v509_v4 = vld [vmem:[#allocation2 + $0x8] sm:$0xff]  ;;  %v511_v5 = vld [vmem:[#allocation2 + $0x50] sm:$0xff]  ;;  %392 = vmatprep.subr.mxu0 %v463_v24  ;;  %397 = vmatprep.subr.mxu1 %v463_v24  ;;  %vm464_vm1 = vmmov 0   ;;  %vm97_vm2 = vcmask 130112   ;;  %vm104_vm3 = vcmask 195712  }
  0x15   :  { %v513_v6 = vld [vmem:[#allocation2 + $0x58] sm:$0xff]  ;;  %v45_v7 = vadd.f32 %v509_v4, %v505_v2  ;;  %v517_v8 = vld [vmem:[#allocation2 + $0x10] sm:$0xff]  ;;  %v525_v12 = vld [vmem:[#allocation2 + $0x60] sm:$0xff]  ;;  %394 = vmatprep.mubr.msk.f32.mxu0 %vm464_vm1, %v463_v24  ;;  %399 = vmatprep.mubr.msk.f32.mxu1 %vm464_vm1, %v463_v24  ;;  %v87_v28 = vand.u32 127, %v86_v26  ;;  %v89_v33 = vshrl.u32 %v86_v26, 7  ;;  %vm111_vm4 = vcmask 261312  }
  0x16   :  { %v519_v9 = vld [vmem:[#allocation2 + $0x18] sm:$0xff]  ;;  %58 = vadd.xlane.f32.xlu1 %v57_v3  ;;  %v60_v10 = vadd.f32 %v513_v6, %v511_v5  ;;  %v527_v13 = vld [vmem:[#allocation2 + $0x68] sm:$0xff]  ;;  %v529_v14 = vld [vmem:[#allocation2 + $0x20] sm:$0xff]  ;;  %vm132_vm5 = vcmask 1041409   ;;  %vm216_vm6 = vcmask 1041408   ;;  %vm212_vm7 = vcmask 15360  }
  0x17   :  { %46 = vadd.xlane.f32.xlu0 %v45_v7  ;;  %v48_v11 = vadd.f32 %v519_v9, %v517_v8  ;;  %v531_v15 = vld [vmem:[#allocation2 + $0x28] sm:$0xff]  ;;  %v63_v16 = vadd.f32 %v527_v13, %v525_v12  ;;  %v537_v18 = vld [vmem:[#allocation2 + $0x70] sm:$0xff]  ;;  %v539_v19 = vld [vmem:[#allocation2 + $0x78] sm:$0xff]  ;;  %v92_v30 = vadd.s32 4294967288, %v87_v28  ;;  %v99_v32 = vadd.s32 4294967280, %v87_v28 }
  0x18   :  { %v51_v17 = vadd.f32 %v531_v15, %v529_v14  ;;  %v541_v20 = vld [vmem:[#allocation2 + $0x30] sm:$0xff]  ;;  %v543_v21 = vld [vmem:[#allocation2 + $0x38] sm:$0xff]  ;;  %v66_v22 = vadd.f32 %v539_v19, %v537_v18  ;;  %v77_v25 = vld [vmem:[%s589_s1] sm:$0x3]  ;;  %v106_v37 = vadd.s32 4294967272, %v87_v28  ;;  %v90_v41 = vsub.s32 %v87_v28, %v89_v33 }
  0x19   :  { %v54_v23 = vadd.f32 %v543_v21, %v541_v20  ;;  %393 = vmatpush3.xpose.msk.msra.mxu0 %vm134_vm0, %v77_v25  ;;  %v95_v35 = vsub.s32 %v92_v30, %v89_v33  ;;  %v102_v39 = vsub.s32 %v99_v32, %v89_v33  ;;  %v298_v28 = vsub.s32 0, %v89_v33 }
  0x1a   :  { %61 = vadd.xlane.f32.xlu1 %v60_v10  ;;  %v109_v48 = vsub.s32 %v106_v37, %v89_v33 }
  0x1b   :  { %49 = vadd.xlane.f32.xlu0 %v48_v11  ;;  %v211_v11 = vld [vmem:[%s590_s2] sm:$0x3]  ;;  %s465_s2 = smov [#allocation5]  }
  0x1c   :  { %398 = vmatpush3.msk.msra.mxu1 %vm216_vm6, %v211_v11  ;;  %s371_s28 = sshll.u32 %s465_s2, 4  ;;  %s372_s28 = int_to_ptr.vmem [resolvable:$true] %s371_s28 }
  0x1d   :  { %s434_s29 = scalar_lea.vmem %s372_s28, 2048  ;;  %p439_p9 = scmp.lt.s32.totalorder %s372_s28, %s372_s28 }
  0x1e   :  { %64 = vadd.xlane.f32.xlu1 %v63_v16  ;;  %p435_p8 = scmp.ne.s32.totalorder %s372_s28, %s434_s29  ;;  %p440_p10 = scmp.lt.s32.totalorder %s434_s29, %s434_s29 }
  0x1f   :  { %52 = vadd.xlane.f32.xlu0 %v51_v17 }
  0x20   :  { %p441_p11 = por %p440_p10, %p439_p9 }
  0x22   :  { %67 = vadd.xlane.f32.xlu1 %v66_v22  ;;  %p442_p12 = pnand %p441_p11, %p435_p8 }
  0x23   :  { %55 = vadd.xlane.f32.xlu0 %v54_v23 }
  0xa3   :  { %v59_v27 = vpop.xlane.xlu1 %58 }
  0xa4   :  { %v47_v29 = vpop.xlane.xlu0 %46  ;;  %v73_v42 = vmul.f32 0.00390625, %v59_v27 }
  0xa5   :  { %v69_v45 = vmul.f32 0.00390625, %v47_v29 }
  0xa6   :  { %v116_v52 = vrot.slane %v73_v42, %v90_v41 }
  0xa7   :  { %v62_v31 = vpop.xlane.xlu1 %61  ;;  %v91_v56 = vrot.slane %v69_v45, %v90_v41 }
  0xa8   :  { %v50_v34 = vpop.xlane.xlu0 %49  ;;  %v74_v36 = vmul.f32 0.00390625, %v62_v31  ;;  %v317_v31 = vsub.s32 1, %v89_v33 }
  0xa9   :  { %v70_v38 = vmul.f32 0.00390625, %v50_v34 }
  0xaa   :  { %v120_v47 = vrot.slane %v74_v36, %v95_v35 }
  0xab   :  { %v65_v40 = vpop.xlane.xlu1 %64  ;;  %v96_v49 = vrot.slane %v70_v38, %v95_v35 }
  0xac   :  { %v75_v43 = vmul.f32 0.00390625, %v65_v40  ;;  %v53_v44 = vpop.xlane.xlu0 %52  ;;  %v121_v58 = vsel %vm97_vm2, %v120_v47, %v116_v52 }
  0xad   :  { %v71_v46 = vmul.f32 0.00390625, %v53_v44  ;;  %v98_v60 = vsel %vm97_vm2, %v96_v49, %v91_v56 }
  0xae   :  { %v125_v50 = vrot.slane %v75_v43, %v102_v39 }
  0xaf   :  { %v68_v51 = vpop.xlane.xlu1 %67  ;;  %v103_v53 = vrot.slane %v71_v46, %v102_v39 }
  0xb0   :  { %v76_v54 = vmul.f32 0.00390625, %v68_v51  ;;  %v56_v55 = vpop.xlane.xlu0 %55  ;;  %v126_v61 = vsel %vm104_vm3, %v125_v50, %v121_v58 }
  0xb1   :  { %v72_v57 = vmul.f32 0.00390625, %v56_v55  ;;  %v105_v63 = vsel %vm104_vm3, %v103_v53, %v98_v60 }
  0xb2   :  { %v130_v59 = vrot.slane %v76_v54, %v109_v48 }
  0xb3   :  { %v110_v62 = vrot.slane %v72_v57, %v109_v48 }
  0xb4   :  { %v131_v3 = vsel %vm111_vm4, %v130_v59, %v126_v61 }
  0xb5   :  { %v112_v7 = vsel %vm111_vm4, %v110_v62, %v105_v63 }
  0xb6   :  { %v133_v10 = vsel %vm132_vm5, %v131_v3, %v112_v7 }
  0xb7   :  { %395 = vmatmul.mubr.msk.f32.vlgmr.msra.gmra.mrb[0].mxu0 %vm134_vm0, %v133_v10 }
 0x18a   :  { %v206_v16 = vpop.f32.mrb[0].mxu0 }
 0x18b   :  { %v210_v17 = vmax.f32 %v206_v16, 0.0  ;;  %v396_v22 = vpop.f32.mrb[1].mxu0 }
 0x18d   :  { %400 = vmatmul.mubr.msk.f32.vlgmr.msra.gmra.mrb[0].mxu1 %vm212_vm7, %v210_v17 }
 0x260   :  { %v286_v23 = vpop.f32.mrb[0].mxu1 }
 0x261   :  { %v387_v24 = vmul.f32 -1.442695, %v286_v23  ;;  %v401_v25 = vpop.f32.mrb[1].mxu1 }
 0x263   :  { %408 = vpow2.f32 %v387_v24 }
 0x26d   :  { %v409_v26 = vpop.eup %408 }
 0x26e   :  { %v293_v27 = vadd.f32 1.0, %v409_v26 }
 0x270   :  { %410 = vrcp.f32 %v293_v27 }
 0x27a   :  { %v411_v29 = vpop.eup %410 }
 0x27b   :  { %v299_v30 = vrot.slane %v411_v29, %v298_v28  ;;  %v318_v32 = vrot.slane %v411_v29, %v317_v31 }
 0x27d   :  { %305 = vbcast.lane.b32.xlu1 %v299_v30, 264  ;;  %301 = vbcast.lane.b32.xlu0 %v299_v30, 256 }
 0x281   :  { %309 = vbcast.lane.b32.xlu1 %v299_v30, 272  ;;  %320 = vbcast.lane.b32.xlu0 %v318_v32, 256 }
 0x285   :  { %313 = vbcast.lane.b32.xlu1 %v299_v30, 280  ;;  %328 = vbcast.lane.b32.xlu0 %v318_v32, 272 }
 0x289   :  { %324 = vbcast.lane.b32.xlu1 %v318_v32, 264 }
 0x28d   :  { %332 = vbcast.lane.b32.xlu1 %v318_v32, 280 }
 0x2ef   :  { %v306_v34 = vpop.permute.xlu1 %305  ;;  %v302_v35 = vpop.permute.xlu0 %301 }
 0x2f0   :  { %v336_v36 = vmul.f32 %v306_v34, %v517_v8  ;;  %v337_v37 = vmul.f32 %v306_v34, %v519_v9  ;;  %v334_v38 = vmul.f32 %v302_v35, %v505_v2  ;;  %v335_v39 = vmul.f32 %v302_v35, %v509_v4 }
 0x2f2   :  { %352 = vst [vmem:[#allocation5 + $0x10] sm:$0xff] %v336_v36  ;;  %353 = vst [vmem:[#allocation5 + $0x18] sm:$0xff] %v337_v37 }
 0x2f3   :  { %350 = vst [vmem:[#allocation5] sm:$0xff] %v334_v38  ;;  %351 = vst [vmem:[#allocation5 + $0x8] sm:$0xff] %v335_v39  ;;  %v310_v33 = vpop.permute.xlu1 %309  ;;  %v321_v40 = vpop.permute.xlu0 %320 }
 0x2f4   :  { %v338_v41 = vmul.f32 %v310_v33, %v529_v14  ;;  %v339_v42 = vmul.f32 %v310_v33, %v531_v15  ;;  %v342_v43 = vmul.f32 %v321_v40, %v501_v0  ;;  %v343_v8 = vmul.f32 %v321_v40, %v503_v1 }
 0x2f6   :  { %354 = vst [vmem:[#allocation5 + $0x20] sm:$0xff] %v338_v41  ;;  %355 = vst [vmem:[#allocation5 + $0x28] sm:$0xff] %v339_v42 }
 0x2f7   :  { %358 = vst [vmem:[#allocation5 + $0x40] sm:$0xff] %v342_v43  ;;  %359 = vst [vmem:[#allocation5 + $0x48] sm:$0xff] %v343_v8  ;;  %v314_v2 = vpop.permute.xlu1 %313  ;;  %v329_v4 = vpop.permute.xlu0 %328 }
 0x2f8   :  { %v340_v9 = vmul.f32 %v314_v2, %v541_v20  ;;  %v341_v44 = vmul.f32 %v314_v2, %v543_v21  ;;  %v346_v45 = vmul.f32 %v329_v4, %v525_v12  ;;  %v347_v14 = vmul.f32 %v329_v4, %v527_v13 }
 0x2fa   :  { %356 = vst [vmem:[#allocation5 + $0x30] sm:$0xff] %v340_v9  ;;  %357 = vst [vmem:[#allocation5 + $0x38] sm:$0xff] %v341_v44 }
 0x2fb   :  { %362 = vst [vmem:[#allocation5 + $0x60] sm:$0xff] %v346_v45  ;;  %363 = vst [vmem:[#allocation5 + $0x68] sm:$0xff] %v347_v14  ;;  %v325_v0 = vpop.permute.xlu1 %324 }
 0x2fc   :  { %v344_v1 = vmul.f32 %v325_v0, %v511_v5  ;;  %v345_v15 = vmul.f32 %v325_v0, %v513_v6 }
 0x2fe   :  { %360 = vst [vmem:[#allocation5 + $0x50] sm:$0xff] %v344_v1  ;;  %361 = vst [vmem:[#allocation5 + $0x58] sm:$0xff] %v345_v15 }
 0x2ff   :  { %v333_v20 = vpop.permute.xlu1 %332 }
 0x300   :  { %v348_v21 = vmul.f32 %v333_v20, %v537_v18  ;;  %v349_v12 = vmul.f32 %v333_v20, %v539_v19 }
 0x302   :  { %364 = vst [vmem:[#allocation5 + $0x70] sm:$0xff] %v348_v21  ;;  %365 = vst [vmem:[#allocation5 + $0x78] sm:$0xff] %v349_v12 }
 0x303   :  { %445 = shalt.err (!%p442_p12)
}
 0x304   :  { %s446_s5 = scalar_lea.hbm %s591_s3, 2048 }
 0x305   :  { %p447_p13 = scmp.ne.s32.totalorder %s591_s3, %s446_s5  ;;  %p450_p0 = scmp.lt.u32.totalorder %s446_s5, %s591_s3 }
 0x307   :  { %p452_p1 = pnand %p450_p0, %p447_p13 }
 0x309   :  { %455 = shalt.err (!%p452_p1)
}
 0x30a   :  { %377 = dma.vmem_to_hbm [thread:$0]  %s372_s28, 2048, %s591_s3, [#allocation4], %s461_s22, %s461_s22, %s462_s23  }
 0x30b   :  { %458 = dma.done.wait [#allocation4], 2048  }
 0x30c   :  { %459 = vsyncadd [#allocation4], 4294965248 }
 0x30d   :  { %381 = vsyncpa [#allocation3], 1 }
 0x30e   :  { %382 = vsyncpa [#allocation4], 1 }

</bundles_post_ra>
